<compile_context>
chip_gen: v5e
topology: v5e:2x2
jax: 0.10.0
libtpu: 0.0.40
codegen_flags: <defaults>
</compile_context>

<pallas_src>
import functools
import math

import jax
import jax.numpy as jnp
from jax import lax
from jax.experimental import pallas as pl
from jax.experimental.pallas import tpu as pltpu


_STATIC_UNROLL_MAX = 8   # fully unroll the per-patch loop only when this short


def _cdiv(a, b):
    return -(-a // b)


def _patchify_kernel(x_ref, o_ref, *, seq_len, seq_start, patch_length,
                     patch_stride, p_tile, win_len, ragged, align):
    # x_ref: (1, S, c_tile)              channels in lanes
    # o_ref: (1, c_tile, p_tile * L)     flattened patches in lanes (lane-dense)
    L = patch_length
    pb = pl.program_id(2)

    win_start = seq_start + pb * (p_tile * patch_stride)
    if ragged:
        # The last patch block runs past the valid patches; clamp the window so
        # the sublane read stays inside the input block.  Valid patches are
        # unaffected (their rows are still inside the clamped window, at offset
        # `overshoot + j*stride`); the extra patches only fill the padded part
        # of the output block, which Pallas never writes back to HBM.
        win_start_raw = win_start
        win_start = jnp.minimum(win_start, seq_len - win_len)
        overshoot = win_start_raw - win_start
    else:
        overshoot = 0
    if align is not None:
        win_start = pl.multiple_of(win_start, align)

    window = x_ref[0, pl.ds(win_start, win_len), :]      # (win_len, c_tile)
    xt = jnp.transpose(window, (1, 0))                   # (c_tile, win_len) XLU

    if patch_stride == L and not ragged:
        # Non-overlapping patches: flattened output == transposed window.
        o_ref[0, :, :] = xt
        return

    if p_tile <= _STATIC_UNROLL_MAX:
        # Short trip count: static loop, fully visible to the scheduler.
        for j in range(p_tile):
            if ragged:
                patch = lax.dynamic_slice_in_dim(
                    xt, overshoot + j * patch_stride, L, axis=1)
            else:
                patch = xt[:, j * patch_stride: j * patch_stride + L]
            o_ref[0, :, j * L:(j + 1) * L] = patch
    else:
        # Long trip count: rolled loop with modest unroll (avoids bundle bloat).
        def body(j, carry):
            src = j * patch_stride + overshoot
            patch = lax.dynamic_slice_in_dim(xt, src, L, axis=1)
            dst = pl.multiple_of(j * L, L)
            o_ref[0, :, pl.ds(dst, L)] = patch
            return carry

        lax.fori_loop(0, p_tile, body, 0, unroll=min(8, p_tile))


def patchtst_patchify(past_values, *, context_length, patch_length,
                      patch_stride):
    """JAX/Pallas equivalent of PatchTSTPatchify.forward.

    past_values: (batch, sequence_length, num_channels)
    returns:     (batch, num_channels, num_patches, patch_length)
    """
    if context_length <= patch_length:
        raise ValueError(
            f"Sequence length ({context_length}) has to be greater than the "
            f"patch length ({patch_length})")

    B, S, C = past_values.shape
    L = patch_length
    num_patches = (S - L) // patch_stride + 1
    if num_patches < 1:
        raise ValueError("sequence too short for one patch")
    new_sequence_length = L + patch_stride * (num_patches - 1)
    sequence_start = S - new_sequence_length

    itemsize = jnp.dtype(past_values.dtype).itemsize
    BUDGET = 16 * 1024 * 1024   # target tile working set, safe on all gens

    # ---- channel tiling ------------------------------------------------
    # Rough per-channel working set: double-buffered input + double-buffered
    # output block + transposed window (output lanes capped by patch tiling).
    out_lanes_est = min(num_patches * L, 2048)
    per_c = itemsize * (2 * S + 4 * out_lanes_est)
    if C <= 128 or per_c * C <= BUDGET:
        # Full channel dim as a single block: avoids ragged/padded channel
        # blocks (e.g. C=320) and is the only legal choice for C <= 128.
        # TODO(synk): very long sequences with C <= 128 cannot be channel-tiled;
        # they would need manual sequence-window DMA tiling to stay in VMEM.
        c_tile = C
    else:
        c_tile = min((C // 128) * 128,
                     max(128, (BUDGET // per_c) // 128 * 128))
    num_c_blocks = _cdiv(C, c_tile)

    # ---- patch tiling ----------------------------------------------------
    in_bytes = 2 * S * c_tile * itemsize
    per_patch = 2 * itemsize * c_tile * (L + max(L, patch_stride))
    avail = max(BUDGET - in_bytes, per_patch)
    p_tile = min(num_patches, max(1, avail // per_patch))
    steps_bc = B * num_c_blocks
    TARGET_STEPS = 4   # enough pipeline steps to overlap writeback / feed 2 TCs
    if steps_bc * _cdiv(num_patches, p_tile) < TARGET_STEPS:
        want_blocks = _cdiv(TARGET_STEPS, steps_bc)
        p_tile = min(p_tile, max(1, _cdiv(num_patches, want_blocks)))
    if p_tile < num_patches:
        # The output block's lane width p_tile*L must be a multiple of 128
        # unless the block covers the whole flattened P*L axis.
        q = 128 // math.gcd(L, 128)
        p_tile = max(q, (p_tile // q) * q)
        if p_tile >= num_patches:
            p_tile = num_patches
    num_p_blocks = _cdiv(num_patches, p_tile)
    ragged = (num_patches % p_tile) != 0
    win_len = (p_tile - 1) * patch_stride + L

    # Dtype-aware sublane-alignment hint for the dynamic window read
    # (8 rows for f32, 16 for bf16, 32 for int8).
    pack = 8 * max(1, 4 // itemsize) if itemsize <= 4 else 8
    aligned = (sequence_start % pack == 0
               and (p_tile * patch_stride) % pack == 0
               and (not ragged or (S - win_len) % pack == 0))
    align = pack if aligned else None

    # Explicit scoped-VMEM limit sized for this shape: input + output double
    # buffers + window + transposed window, with 1.5x + headroom.  Capped at
    # 40 MiB (safe under v7x's 64 MiB physical VMEM, trivially fine on
    # v5e/v6e's 128 MiB); floor keeps the compiler unconstrained for tiny shapes.
    tiles_bytes = itemsize * c_tile * (2 * S + 2 * p_tile * L + 2 * win_len)
    vmem_limit = int(min(max(tiles_bytes + tiles_bytes // 2 + (2 << 20),
                             16 << 20), 40 << 20))

    kernel = functools.partial(
        _patchify_kernel,
        seq_len=S, seq_start=sequence_start, patch_length=L,
        patch_stride=patch_stride, p_tile=p_tile, win_len=win_len,
        ragged=ragged, align=align)

    out_flat = pl.pallas_call(
        kernel,
        out_shape=jax.ShapeDtypeStruct((B, C, num_patches * L),
                                       past_values.dtype),
        grid_spec=pltpu.PrefetchScalarGridSpec(
            num_scalar_prefetch=0,
            grid=(B, num_c_blocks, num_p_blocks),
            # Input index_map is constant in the (innermost) patch axis, so the
            # (1, S, c_tile) block is DMA'd once per (b, c) and reused.
            in_specs=[pl.BlockSpec((1, S, c_tile), lambda b, c, p: (b, 0, c))],
            out_specs=pl.BlockSpec((1, c_tile, p_tile * L),
                                   lambda b, c, p: (b, c, p)),
        ),
        compiler_params=pltpu.CompilerParams(
            dimension_semantics=("parallel", "parallel", "parallel"),
            vmem_limit_bytes=vmem_limit),
    )(past_values)

    # Trailing-dim split: (B, C, P*L) -> (B, C, P, L); no data movement.
    return out_flat.reshape(B, C, num_patches, L)


def _reference(past_values, patch_length, patch_stride):
    # Pure-JAX reference matching the torch semantics.
    S = past_values.shape[-2]
    num_patches = (S - patch_length) // patch_stride + 1
    new_seq = patch_length + patch_stride * (num_patches - 1)
    start = S - new_seq
    x = past_values[:, start:, :]                                   # (B, new_seq, C)
    patches = jnp.stack(
        [x[:, p * patch_stride: p * patch_stride + patch_length, :]
         for p in range(num_patches)],
        axis=1,
    )                                                               # (B, P, L, C)
    return jnp.transpose(patches, (0, 3, 1, 2))                     # (B, C, P, L)


def _check(key, batch, context_length, num_channels, patch_length, patch_stride):
    past_values = jax.random.normal(
        key, (batch, context_length, num_channels), dtype=jnp.float32)
    out = patchtst_patchify(
        past_values,
        context_length=context_length,
        patch_length=patch_length,
        patch_stride=patch_stride,
    )
    out = jax.block_until_ready(out)
    ref = _reference(past_values, patch_length, patch_stride)
    assert out.shape == ref.shape, (out.shape, ref.shape)
    assert jnp.array_equal(out, ref), "Pallas patchify output mismatch vs reference"


if __name__ == "__main__":
    root = jax.random.PRNGKey(0)
    k1, k2, k3, k4, k5 = jax.random.split(root, 5)

    # 1) Small case: full-dim blocks, static patch loop, overlapping patches.
    #    num_patches = (16 - 8) // 4 + 1 = 3
    _check(k1, batch=2, context_length=16, num_channels=4,
           patch_length=8, patch_stride=4)

    # 2) Overlapping patches with patch-axis tiling (ragged last patch block,
    #    dynamic in-kernel offsets).  num_patches = 15, p_tile = 8.
    _check(k2, batch=2, context_length=128, num_channels=256,
           patch_length=16, patch_stride=8)

    # 3) Non-multiple-of-128 channel count handled as a single full-C block.
    #    num_patches = (64 - 16) // 8 + 1 = 7
    _check(k3, batch=2, context_length=64, num_channels=320,
           patch_length=16, patch_stride=8)

    # 4) Non-overlapping patches: contiguous fast path + multiple patch blocks.
    #    num_patches = 32, p_tile = 8.
    _check(k4, batch=1, context_length=1024, num_channels=64,
           patch_length=32, patch_stride=32)

    # 5) Many small overlapping patches: exercises the rolled fori_loop path.
    #    num_patches = (130 - 4) // 2 + 1 = 64
    _check(k5, batch=4, context_length=130, num_channels=8,
           patch_length=4, patch_stride=2)

    print("KERNEL_OK")
</pallas_src>

<mosaic_0001>
module attributes {stable_mosaic.version = 11 : i64} {
  func.func @_patchify_kernel(%arg0: i32, %arg1: i32, %arg2: i32, %arg3: memref<1x16x4xf32, #tpu.memory_space<vmem>>, %arg4: memref<1x4x24xf32, #tpu.memory_space<vmem>>) attributes {dimension_semantics = [#tpu.dimension_semantics<parallel>, #tpu.dimension_semantics<parallel>, #tpu.dimension_semantics<parallel>], iteration_bounds = array<i64: 2, 1, 1>, scalar_prefetch = 0 : i64, scratch_operands = 0 : i64, tpu.core_type = #tpu.core_type<tc>, window_params = [{transform_indices = @transform_0, window_bounds = array<i64: 1, 16, 4>}, {transform_indices = @transform_1, window_bounds = array<i64: 1, 4, 24>}]} {
    %c12_i32 = arith.constant 12 : i32
    %0 = arith.muli %arg2, %c12_i32 : i32
    %c0_i32 = arith.constant 0 : i32
    %1 = arith.addi %c0_i32, %0 : i32
    %c0 = arith.constant 0 : index
    %2 = arith.index_cast %1 : i32 to index
    %c0_0 = arith.constant 0 : index
    %3 = vector.load %arg3[%c0, %2, %c0_0] : memref<1x16x4xf32, #tpu.memory_space<vmem>>, vector<1x16x4xf32>
    %4 = vector.shape_cast %3 : vector<1x16x4xf32> to vector<16x4xf32>
    %5 = tpu.transpose %4, [1, 0] : vector<16x4xf32> -> vector<4x16xf32>
    %6 = vector.extract_strided_slice %5 {offsets = [0, 0], sizes = [4, 8], strides = [1, 1]} : vector<4x16xf32> to vector<4x8xf32>
    %c0_1 = arith.constant 0 : index
    %c0_2 = arith.constant 0 : index
    %c0_3 = arith.constant 0 : index
    %7 = vector.load %arg4[%c0_1, %c0_2, %c0_3] : memref<1x4x24xf32, #tpu.memory_space<vmem>>, vector<1x4x8xf32>
    %8 = vector.shape_cast %7 : vector<1x4x8xf32> to vector<4x8xf32>
    %9 = vector.shape_cast %6 : vector<4x8xf32> to vector<1x4x8xf32>
    tpu.vector_store %arg4[%c0_1, %c0_2, %c0_3], %9 {strides = array<i32>} : memref<1x4x24xf32, #tpu.memory_space<vmem>>, vector<1x4x8xf32>,
    %10 = vector.extract_strided_slice %5 {offsets = [0, 4], sizes = [4, 8], strides = [1, 1]} : vector<4x16xf32> to vector<4x8xf32>
    %c0_4 = arith.constant 0 : index
    %c0_5 = arith.constant 0 : index
    %c8 = arith.constant 8 : index
    %11 = vector.load %arg4[%c0_4, %c0_5, %c8] : memref<1x4x24xf32, #tpu.memory_space<vmem>>, vector<1x4x8xf32>
    %12 = vector.shape_cast %11 : vector<1x4x8xf32> to vector<4x8xf32>
    %13 = vector.shape_cast %10 : vector<4x8xf32> to vector<1x4x8xf32>
    tpu.vector_store %arg4[%c0_4, %c0_5, %c8], %13 {strides = array<i32>} : memref<1x4x24xf32, #tpu.memory_space<vmem>>, vector<1x4x8xf32>,
    %14 = vector.extract_strided_slice %5 {offsets = [0, 8], sizes = [4, 8], strides = [1, 1]} : vector<4x16xf32> to vector<4x8xf32>
    %c0_6 = arith.constant 0 : index
    %c0_7 = arith.constant 0 : index
    %c16 = arith.constant 16 : index
    %15 = vector.load %arg4[%c0_6, %c0_7, %c16] : memref<1x4x24xf32, #tpu.memory_space<vmem>>, vector<1x4x8xf32>
    %16 = vector.shape_cast %15 : vector<1x4x8xf32> to vector<4x8xf32>
    %17 = vector.shape_cast %14 : vector<4x8xf32> to vector<1x4x8xf32>
    tpu.vector_store %arg4[%c0_6, %c0_7, %c16], %17 {strides = array<i32>} : memref<1x4x24xf32, #tpu.memory_space<vmem>>, vector<1x4x8xf32>,
    return
  }
  func.func @transform_0(%arg0: i32, %arg1: i32, %arg2: i32) -> (i32, i32, i32) {
    %c0_i32 = arith.constant 0 : i32
    %c0_i32_0 = arith.constant 0 : i32
    return %arg0, %c0_i32, %arg1 : i32, i32, i32
  }
  func.func @transform_1(%arg0: i32, %arg1: i32, %arg2: i32) -> (i32, i32, i32) {
    %c0_i32 = arith.constant 0 : i32
    return %arg0, %arg1, %arg2 : i32, i32, i32
  }
}

</mosaic_0001>

<bundles_post_ra>
// kernel: tpu_custom_call.1
= control target key start
LH: loop header
LB: loop body
LE: loop exit
PB: predicated region body
PF: predicated region fallthrough
CT: control target
= control target key end

     0   :  { %6 = vsyncpa [#allocation3], 0  ;;  %s556_s0 = inlined_call_operand.vmem [shape: f32[2,16,4], index: 0, kind: input, shape index: {}]   ;;  %s557_s1 = inlined_call_operand.hbm [shape: f32[2,4,24], index: 1, kind: output, shape index: {}]  }
   0x1   :  { %8 = vsyncpa [#allocation3 + $0x1], 0  ;;  %s459_s6 = smov 0   ;;  %s461_s7 = smov 0  }
   0x2   :  { %s463_s8 = smov 0   ;;  %s465_s9 = smov 0  }
   0x3   :  { %s467_s10 = smov 0   ;;  %s469_s11 = smov 0  }
   0x4 LB: > { %s296_s12 = sadd.s32 4294967295, %s445_s11   ;;  %s297_s13 = sadd.s32 4294967294, %s445_s11   ;;  %s445_s11 = sphi %s469_s11, %s14_s11   ;;  %s441_s10 = sphi %s467_s10, %s564_s10   ;;  %s437_s9 = sphi %s465_s9, %s563_s9   ;;  %s433_s8 = sphi %s463_s8, %s562_s8   ;;  %s429_s7 = sphi %s461_s7, %s561_s7   ;;  %s425_s6 = sphi %s459_s6, %s560_s6  }
   0x5   : > { %s33_s14 = sadd.s32 1, %s441_s10  ;;  %s72_s15 = sadd.s32 1, %s433_s8 }
   0x6   : > { %p35_p0 = scmp.ge.s32.totalorder %s33_s14, 2  ;;  %p82_p1 = scmp.ne.s32.totalorder %s433_s8, %s429_s7 }
   0x7   : > { %p83_p2 = scmp.eq.s32.totalorder %s296_s12, 1  ;;  %p88_p3 = scmp.ne.s32.totalorder %s429_s7, %s425_s6 }
   0x8   : > { %s566_s14 = smov (%p35_p0, %s33_s14), 0  ;;  %p89_p5 = scmp.eq.s32.totalorder %s297_s13, 1 }
   0x9   : > { %p499_p4 = por %p83_p2, %p82_p1  ;;  %s65_s17 = ssub.s32 %s441_s10, %s566_s14 }
   0xa   : > { %p300_p6 = scmp.ge.s32.totalorder %s445_s11, 1  ;;  %p70_p7 = scmp.eq.s32.totalorder %s65_s17, 0 }
   0xb   : > { %p506_p8 = por %p89_p5, %p88_p3  ;;  %p118_p9 = scmp.lt.s32.totalorder %s445_s11, 3 }
   0xc   : > { %s512_s19 = scalar_select %p70_p7, %s433_s8, %s72_s15  }
   0xd   : > { %p119_p10 = pnand %p300_p6, %p118_p9 }
   0xe   : > { %p141_p11 = scmp.lt.s32.totalorder (!%p119_p10), %s437_s9, 1  ;;  %s138_s25 = sand.u32 (!%p119_p10), 1, %s429_s7  }
   0xf   : > { %122 = sbr.rel (%p119_p10) target bundleno = 316 (0x13c), region = 24  ;;  %s301_s26 = sshll.u32 (!%p119_p10), %s138_s25, 2 }
  0x10   : > { %s140_s27 = scalar_lea.vmem (!%p119_p10), [#allocation2], %s301_s26  ;;  %s447_s28 = smov (!%p119_p10), 4  }
  0x11   : > { %s448_s29 = smov (!%p119_p10), 8   ;;  %s305_s30 = sshll.u32 (!%p119_p10), %s437_s9, 2 }
  0x12   : > { %s211_s4 = scalar_lea.hbm (!%p119_p10), %s557_s1, %s305_s30  ;;  %s213_s5 = sshll.u32 (!%p119_p10), %s140_s27, 4  ;;  %s214_s5 = int_to_ptr.vmem [resolvable:$true] %s213_s5 }
  0x13   : > { %s215_s12 = sshll.u32 (!%p119_p10), %s211_s4, 4  ;;  %s199_s13 = scalar_lea.sflag (!%p119_p10), [#allocation3], %s138_s25  ;;  %s216_s12 = int_to_ptr.hbm [resolvable:$true] %s215_s12 }
  0x14   : > { %s142_s20 = scalar_select %p141_p11, %s437_s9, 1  ;;  %vm185_vm0 = vcmask 60416   ;;  %vm191_vm1 = vcmask 126016   ;;  %vm196_vm2 = vcmask 191616  }
  0x15   : > { %s381_s15 = sshra.s32 %s216_s12, 4  ;;  %s382_s15 = int_to_ptr.hbm [resolvable:$true] %s381_s15 }
  0x16   : > { %s308_s21 = sshll.u32 %s142_s20, 4  ;;  %s383_s17 = scalar_lea.hbm %s382_s15, 4 }
  0x17   : > { %s148_s24 = scalar_lea.vmem %s556_s0, %s308_s21  ;;  %p384_p12 = scmp.ne.s32.totalorder %s382_s15, %s383_s17 }
  0x18   : > { %v151_v0 = vld [vmem:[%s148_s24] sm:$0xff]  ;;  %v152_v1 = vld [vmem:[%s148_s24 + $0x8] sm:$0xff]  ;;  %s387_s21 = scalar_lea.hbm %s557_s1, 8  ;;  %p388_p1 = scmp.lt.s32.totalorder %s382_s15, %s557_s1 }
  0x19   : > { %153 = vxpose.xlu0.b32.start [1/2] (short) (narrow) %v151_v0, 8  ;;  %p385_p13 = pnand %p384_p12, %p499_p4  ;;  %p389_p2 = scmp.lt.s32.totalorder %s387_s21, %s383_s17 }
  0x1b   : > { %p386_p0 = pneg %p385_p13  ;;  %p390_p3 = por %p389_p2, %p388_p1 }
  0x1d   : > { %p391_p5 = pnand %p390_p3, %p386_p0 }
  0x21   : > { %154 = vxpose.xlu0.b32.end [2/2] (short) (narrow) %v152_v1, 8 }
  0xbd   : > { %v169_v2 = vpop.trf.xlu0 }
  0xbe   : > { %186 = vst.msk [vmem:[%s140_s27] sm:$0xf] %vm185_vm0, %v169_v2  ;;  %188 = vrot.lane.b32.xlu1 %v169_v2, %s447_s28 }
  0xc6   : > { %193 = vrot.lane.b32.xlu1 %v169_v2, %s448_s29 }
 0x130   : > { %v189_v3 = vpop.permute.xlu1 %188 }
 0x131   : > { %192 = vst.msk [vmem:[%s140_s27] sm:$0xf] %vm191_vm1, %v189_v3 }
 0x138   : > { %v194_v4 = vpop.permute.xlu1 %193 }
 0x139   : > { %197 = vst.msk [vmem:[%s140_s27] sm:$0xf] %vm196_vm2, %v194_v4 }
 0x13a   : > { %394 = shalt.err (!%p391_p5)
}
 0x13b   : > { %309 = dma.vmem_to_hbm [thread:$0]  (%p499_p4), %s214_s5, 64, %s216_s12, %s199_s13  }
 0x13c PF: > { %p315_p6 = scmp.ge.s32.totalorder %s445_s11, 2  ;;  %s227_s24 = sand.u32 1, %s425_s6  }
 0x13d   : > { %s228_s25 = scalar_lea.sflag [#allocation3], %s227_s24 }
 0x13e   : > { %p312_p7 = pnand %p315_p6, %p506_p8 }
 0x140   : > { %p313_p9 = pneg %p312_p7 }
 0x142   : > { %420 = dma.done.wait (%p313_p9), %s228_s25, 64  }
 0x143   : > { %422 = vsyncadd (%p313_p9), %s228_s25, 4294967232  ;;  %s14_s11 = sadd.s32 1, %s445_s11   ;;  %s560_s6 = smov %s429_s7 }
 0x144   : > { %p11_p10 = scmp.ge.s32.totalorder %s14_s11, 4   ;;  %s561_s7 = smov %s433_s8 }
 0x145   : > { %s562_s8 = smov %s512_s19  ;;  %s563_s9 = smov %s441_s10 }
 0x146   : > { %s564_s10 = smov %s566_s14  ;;  %13 = sbr.rel (!%p11_p10) target bundleno = 4 (0x4), region = 60 }
 0x14b   :  { %234 = vsyncpa [#allocation3], 1 }
 0x14c   :  { %236 = vsyncpa [#allocation3 + $0x1], 1 }

</bundles_post_ra>
